<compile_context>
chip_gen: v7x
topology: tpu7x:2x2x1
jax: 0.10.0
libtpu: 0.0.40
codegen_flags: <defaults>
</compile_context>

<pallas_src>
import jax
import jax.numpy as jnp
from jax.experimental import pallas as pl
from jax.experimental.pallas import tpu as pltpu

N_INPUT = 10
N_HIDDEN = 32
N_CLASSES = 4
GATE_W = 4 * N_HIDDEN   # 128: all four gates packed into one 128-lane block


def lstm_kernel(x_ref, w_ih_ref, w_hh_ref, b_ref, w_out_ref, b_out_ref, o_ref):
    # x_ref:     (S, Bt, D)   time-leading input tile (f32)
    # w_ih_ref:  (D, 128)     input->gates, gate order [i,f,o,g], bf16
    # w_hh_ref:  (H, 128)     hidden->gates, bf16
    # b_ref:     (1, 128)     b_ih + b_hh folded, f32
    # w_out_ref: (H, 128)     cols [0:4) real, rest zero, f32
    # b_out_ref: (1, 128)     cols [0:4) real, f32
    # o_ref:     (Bt, 128)    softmax probs in lanes [0:4), rest zero
    S, Bt, D = x_ref.shape
    H = N_HIDDEN
    G = GATE_W

    # ---- fused input->gates projection: ONE MXU matmul for all S time steps ----
    # (S, Bt, D) -> (S*Bt, D) is layout-preserving (Bt % 8 == 0 guaranteed by wrapper).
    x_flat = x_ref[...].reshape(S * Bt, D).astype(jnp.bfloat16)
    gi_all = jnp.dot(x_flat, w_ih_ref[...],
                     preferred_element_type=jnp.float32) + b_ref[...]      # (S*Bt, 128) f32

    w_hh = w_hh_ref[...]       # (H, 128) bf16 — constant RHS across all 8 steps
    # TODO(synk): confirm from the bundle dump that Mosaic keeps w_hh resident in the
    # MXU weight registers across the unrolled steps (else drive pltpu.matmul_push_rhs).

    # Hoisted lane masks (broadcast_in_dim is not CSE'd -> build once, reuse).
    lane = jax.lax.broadcasted_iota(jnp.int32, (Bt, G), 1)
    is_sig = lane < 3 * H            # lanes [0:96) = i,f,o (sigmoid); [96:128) = g (tanh)
    is_cls = lane < N_CLASSES        # lanes [0:4)  = real classes for the softmax head

    h = jnp.zeros((Bt, H), jnp.float32)
    c = jnp.zeros((Bt, H), jnp.float32)

    # Static S -> fully unrolled; only h @ w_hh + gate math sit on the serial path.
    for t in range(S):
        gi_t = gi_all[t * Bt:(t + 1) * Bt, :]          # aligned sublane-tile slice (free)
        gates = gi_t + jnp.dot(h.astype(jnp.bfloat16), w_hh,
                               preferred_element_type=jnp.float32)         # (Bt, 128)
        # sigmoid(x) = 0.5 * (1 + tanh(x/2)) -> single EUP tanh pass over all 4 gates.
        th = jnp.tanh(jnp.where(is_sig, gates * 0.5, gates))
        act = jnp.where(is_sig, 0.5 * (th + 1.0), th)
        i_g = act[:, 0 * H:1 * H]
        f_g = act[:, 1 * H:2 * H]
        o_g = act[:, 2 * H:3 * H]
        g_g = act[:, 3 * H:4 * H]
        c = f_g * c + i_g * g_g
        h = o_g * jnp.tanh(c)

    # Output head on the last hidden state; logits padded to 128 lanes so the final
    # store is a full-lane vst; softmax masked to the 4 real classes, exact divide.
    logits = (jnp.dot(h, w_out_ref[...], preferred_element_type=jnp.float32)
              + b_out_ref[...])                                            # (Bt, 128)
    masked = jnp.where(is_cls, logits, jnp.float32(-1e30))
    m = jnp.max(masked, axis=1, keepdims=True)
    e = jnp.where(is_cls, jnp.exp(masked - m), 0.0)
    denom = jnp.sum(e, axis=1, keepdims=True)
    o_ref[...] = e / denom


def _round_up(v, m):
    return ((v + m - 1) // m) * m


def _pick_b_tile(b_pad):
    """b_pad is a multiple of 8.  >=2 grid steps when possible (v7x megacore)."""
    if b_pad <= 8:
        return b_pad
    return min(256, _round_up((b_pad + 1) // 2, 8))
    # NOTE: after the packed-gate layout the per-tile gate stash is only
    # S*b_tile*128*4 B (1 MiB at b_tile=256), far under v5e's 16 MiB default
    # scoped VMEM and v7x's 64 MiB physical VMEM.


def genotyping_lstm_forward(x, packed):
    """x: (B, S, 10) batch_first float32. Returns (B, 4) softmax probs."""
    w_ih_p, w_hh_p, b_p, w_out_p, b_out_p = packed
    B, S, D = x.shape

    # Pad batch to a multiple of 8 so every sublane-dim block / in-kernel flatten
    # is tile-aligned; padded rows are zeros and are sliced away afterwards.
    b_pad = _round_up(B, 8)
    if b_pad != B:
        x = jnp.pad(x, ((0, b_pad - B), (0, 0), (0, 0)))
    x_t = jnp.transpose(x, (1, 0, 2))          # (S, B_pad, D), time leading

    b_tile = _pick_b_tile(b_pad)
    grid = (pl.cdiv(b_pad, b_tile),)

    out_pad = pl.pallas_call(
        lstm_kernel,
        out_shape=jax.ShapeDtypeStruct((b_pad, GATE_W), jnp.float32),
        grid=grid,
        in_specs=[
            pl.BlockSpec((S, b_tile, D), lambda i: (0, i, 0)),   # x: batch-tiled
            pl.BlockSpec(w_ih_p.shape, lambda i: (0, 0)),        # weights stay resident
            pl.BlockSpec(w_hh_p.shape, lambda i: (0, 0)),
            pl.BlockSpec(b_p.shape, lambda i: (0, 0)),
            pl.BlockSpec(w_out_p.shape, lambda i: (0, 0)),
            pl.BlockSpec(b_out_p.shape, lambda i: (0, 0)),
        ],
        out_specs=pl.BlockSpec((b_tile, GATE_W), lambda i: (i, 0)),
        compiler_params=pltpu.CompilerParams(
            dimension_semantics=("parallel",)),                  # megacore on v7x
    )(x_t, w_ih_p, w_hh_p, b_p, w_out_p, b_out_p)
    return out_pad[:B, :N_CLASSES]


def init_torch_params(key, n_hidden=N_HIDDEN, n_input=N_INPUT,
                      n_classes=N_CLASSES):
    """PyTorch-layout LSTM + Linear params, uniform(-1/sqrt(H), 1/sqrt(H))."""
    ks = jax.random.split(key, 6)
    bound = 1.0 / jnp.sqrt(jnp.float32(n_hidden))

    def u(k, shape):
        return jax.random.uniform(k, shape, jnp.float32, -bound, bound)

    return {
        "w_ih": u(ks[0], (4 * n_hidden, n_input)),   # PyTorch gate order i, f, g, o
        "w_hh": u(ks[1], (4 * n_hidden, n_hidden)),
        "b_ih": u(ks[2], (4 * n_hidden,)),
        "b_hh": u(ks[3], (4 * n_hidden,)),
        "w_out": u(ks[4], (n_classes, n_hidden)),
        "b_out": u(ks[5], (n_classes,)),
    }


def pack_params(pt, n_hidden=N_HIDDEN, n_input=N_INPUT, n_classes=N_CLASSES):
    """Repack PyTorch-layout params into the kernel's packed (i,f,o,g) layout.

    All four gates share one 128-lane block (pitch = H = 32); the three sigmoid
    gates occupy lanes [0:96) so the activation mask is a single threshold.
    MXU operands (w_ih, w_hh) are stored bf16; biases / output head stay f32.
    """
    H = n_hidden
    order = (0, 1, 3, 2)   # PyTorch chunks [i,f,g,o] feeding kernel slots [i,f,o,g]
    b_fold = pt["b_ih"] + pt["b_hh"]

    w_ih_p = jnp.zeros((n_input, 4 * H), jnp.float32)
    w_hh_p = jnp.zeros((H, 4 * H), jnp.float32)
    b_p = jnp.zeros((1, 4 * H), jnp.float32)
    for slot, g in enumerate(order):
        rows = slice(g * H, (g + 1) * H)
        cols = slice(slot * H, (slot + 1) * H)
        w_ih_p = w_ih_p.at[:, cols].set(pt["w_ih"][rows].T)
        w_hh_p = w_hh_p.at[:, cols].set(pt["w_hh"][rows].T)
        b_p = b_p.at[0, cols].set(b_fold[rows])

    w_out_p = jnp.zeros((H, 4 * H), jnp.float32)
    w_out_p = w_out_p.at[:, :n_classes].set(pt["w_out"].T)
    b_out_p = jnp.zeros((1, 4 * H), jnp.float32)
    b_out_p = b_out_p.at[0, :n_classes].set(pt["b_out"])
    return (w_ih_p.astype(jnp.bfloat16), w_hh_p.astype(jnp.bfloat16),
            b_p, w_out_p, b_out_p)


def _reference_forward(x, pt):
    """Pure-JAX f32 reference: PyTorch-semantics LSTM + Linear + Softmax."""
    B, S, _ = x.shape
    H = N_HIDDEN
    h = jnp.zeros((B, H), jnp.float32)
    c = jnp.zeros((B, H), jnp.float32)
    b = pt["b_ih"] + pt["b_hh"]
    for t in range(S):
        gates = x[:, t, :] @ pt["w_ih"].T + h @ pt["w_hh"].T + b
        i = jax.nn.sigmoid(gates[:, 0:H])
        f = jax.nn.sigmoid(gates[:, H:2 * H])
        g = jnp.tanh(gates[:, 2 * H:3 * H])
        o = jax.nn.sigmoid(gates[:, 3 * H:4 * H])
        c = f * c + i * g
        h = o * jnp.tanh(c)
    logits = h @ pt["w_out"].T + pt["b_out"]
    return jax.nn.softmax(logits, axis=1)


if __name__ == "__main__":
    key = jax.random.PRNGKey(0)
    k_x, k_p = jax.random.split(key)

    B, S = 2, 8
    x = jax.random.normal(k_x, (B, S, N_INPUT), jnp.float32)
    pt_params = init_torch_params(k_p)
    packed = pack_params(pt_params)

    out = genotyping_lstm_forward(x, packed)
    out = jax.block_until_ready(out)

    ref = _reference_forward(x, pt_params)
    assert out.shape == (B, N_CLASSES)
    assert bool(jnp.all(jnp.isfinite(out)))
    assert jnp.allclose(jnp.sum(out, axis=1), 1.0, atol=1e-4)
    # bf16 MXU inputs (f32 accumulation / state / softmax) -> loosen tolerance slightly.
    assert jnp.allclose(out, ref, atol=1e-2, rtol=1e-2)

    # TODO(synk): n_layers>1 / bidirectional / dropout!=0 branches of the module are
    # not exercised by the chosen config (n_layers=1, dropout=0.0, bidirectional=False)
    # and are not implemented here.
    print("KERNEL_OK")
</pallas_src>

<mosaic_0001>
module attributes {stable_mosaic.version = 11 : i64} {
  func.func @lstm_kernel(%arg0: i32, %arg1: memref<8x8x10xf32, #tpu.memory_space<vmem>>, %arg2: memref<10x128xbf16, #tpu.memory_space<vmem>>, %arg3: memref<32x128xbf16, #tpu.memory_space<vmem>>, %arg4: memref<1x128xf32, #tpu.memory_space<vmem>>, %arg5: memref<32x128xf32, #tpu.memory_space<vmem>>, %arg6: memref<1x128xf32, #tpu.memory_space<vmem>>, %arg7: memref<8x128xf32, #tpu.memory_space<vmem>>) attributes {dimension_semantics = [#tpu.dimension_semantics<parallel>], iteration_bounds = array<i64: 1>, scalar_prefetch = 0 : i64, scratch_operands = 0 : i64, tpu.core_type = #tpu.core_type<tc>, window_params = [{transform_indices = @transform_0, window_bounds = array<i64: 8, 8, 10>}, {pipeline_mode = #tpu.pipeline_mode<synchronous>, transform_indices = @transform_1, window_bounds = array<i64: 10, 128>}, {pipeline_mode = #tpu.pipeline_mode<synchronous>, transform_indices = @transform_2, window_bounds = array<i64: 32, 128>}, {pipeline_mode = #tpu.pipeline_mode<synchronous>, transform_indices = @transform_3, window_bounds = array<i64: 1, 128>}, {pipeline_mode = #tpu.pipeline_mode<synchronous>, transform_indices = @transform_4, window_bounds = array<i64: 32, 128>}, {pipeline_mode = #tpu.pipeline_mode<synchronous>, transform_indices = @transform_5, window_bounds = array<i64: 1, 128>}, {transform_indices = @transform_6, window_bounds = array<i64: 8, 128>}]} {
    %c0 = arith.constant 0 : index
    %c0_0 = arith.constant 0 : index
    %c0_1 = arith.constant 0 : index
    %0 = vector.load %arg1[%c0, %c0_0, %c0_1] : memref<8x8x10xf32, #tpu.memory_space<vmem>>, vector<8x8x10xf32>
    %1 = vector.shape_cast %0 : vector<8x8x10xf32> to vector<64x10xf32>
    %2 = arith.truncf %1 : vector<64x10xf32> to vector<64x10xbf16>
    %c0_2 = arith.constant 0 : index
    %c0_3 = arith.constant 0 : index
    %3 = vector.load %arg2[%c0_2, %c0_3] : memref<10x128xbf16, #tpu.memory_space<vmem>>, vector<10x128xbf16>
    %cst = arith.constant dense<0.000000e+00> : vector<64x128xf32>
    %4 = tpu.matmul %2, %3, %cst {dimension_numbers = #tpu.dot_dimension_numbers<[1], [0], [0], [1], [0, 0, 1, 1], [], []>} : vector<64x10xbf16>, vector<10x128xbf16>, vector<64x128xf32> -> vector<64x128xf32>
    %c0_4 = arith.constant 0 : index
    %c0_5 = arith.constant 0 : index
    %5 = vector.load %arg4[%c0_4, %c0_5] : memref<1x128xf32, #tpu.memory_space<vmem>>, vector<1x128xf32>
    %6 = vector.broadcast %5 : vector<1x128xf32> to vector<64x128xf32>
    %7 = arith.addf %4, %6 : vector<64x128xf32>
    %c0_6 = arith.constant 0 : index
    %c0_7 = arith.constant 0 : index
    %8 = vector.load %arg3[%c0_6, %c0_7] : memref<32x128xbf16, #tpu.memory_space<vmem>>, vector<32x128xbf16>
    %9 = tpu.iota {dimensions = array<i32: 1>} : vector<8x128xi32>
    %c96_i32 = arith.constant 96 : i32
    %10 = vector.broadcast %c96_i32 : i32 to vector<8x128xi32>
    %11 = arith.cmpi slt, %9, %10 : vector<8x128xi32>
    %c4_i32 = arith.constant 4 : i32
    %12 = vector.broadcast %c4_i32 : i32 to vector<8x128xi32>
    %13 = arith.cmpi slt, %9, %12 : vector<8x128xi32>
    %cst_8 = arith.constant 0.000000e+00 : f32
    %14 = vector.broadcast %cst_8 : f32 to vector<8x32xf32>
    %cst_9 = arith.constant 0.000000e+00 : f32
    %15 = vector.broadcast %cst_9 : f32 to vector<8x32xf32>
    %16 = vector.extract_strided_slice %7 {offsets = [0, 0], sizes = [8, 128], strides = [1, 1]} : vector<64x128xf32> to vector<8x128xf32>
    %17 = arith.truncf %14 : vector<8x32xf32> to vector<8x32xbf16>
    %cst_10 = arith.constant dense<0.000000e+00> : vector<8x128xf32>
    %18 = tpu.matmul %17, %8, %cst_10 {dimension_numbers = #tpu.dot_dimension_numbers<[1], [0], [0], [1], [0, 0, 1, 1], [], []>} : vector<8x32xbf16>, vector<32x128xbf16>, vector<8x128xf32> -> vector<8x128xf32>
    %19 = arith.addf %16, %18 : vector<8x128xf32>
    %cst_11 = arith.constant 5.000000e-01 : f32
    %20 = vector.broadcast %cst_11 : f32 to vector<8x128xf32>
    %21 = arith.mulf %19, %20 : vector<8x128xf32>
    %22 = arith.select %11, %21, %19 : vector<8x128xi1>, vector<8x128xf32>
    %23 = math.tanh %22 : vector<8x128xf32>
    %cst_12 = arith.constant 1.000000e+00 : f32
    %24 = vector.broadcast %cst_12 : f32 to vector<8x128xf32>
    %25 = arith.addf %23, %24 : vector<8x128xf32>
    %cst_13 = arith.constant 5.000000e-01 : f32
    %26 = vector.broadcast %cst_13 : f32 to vector<8x128xf32>
    %27 = arith.mulf %26, %25 : vector<8x128xf32>
    %28 = arith.select %11, %27, %23 : vector<8x128xi1>, vector<8x128xf32>
    %29 = vector.extract_strided_slice %28 {offsets = [0, 0], sizes = [8, 32], strides = [1, 1]} : vector<8x128xf32> to vector<8x32xf32>
    %30 = vector.extract_strided_slice %28 {offsets = [0, 32], sizes = [8, 32], strides = [1, 1]} : vector<8x128xf32> to vector<8x32xf32>
    %31 = vector.extract_strided_slice %28 {offsets = [0, 64], sizes = [8, 32], strides = [1, 1]} : vector<8x128xf32> to vector<8x32xf32>
    %32 = vector.extract_strided_slice %28 {offsets = [0, 96], sizes = [8, 32], strides = [1, 1]} : vector<8x128xf32> to vector<8x32xf32>
    %33 = arith.mulf %30, %15 : vector<8x32xf32>
    %34 = arith.mulf %29, %32 : vector<8x32xf32>
    %35 = arith.addf %33, %34 : vector<8x32xf32>
    %36 = math.tanh %35 : vector<8x32xf32>
    %37 = arith.mulf %31, %36 : vector<8x32xf32>
    %38 = vector.extract_strided_slice %7 {offsets = [8, 0], sizes = [8, 128], strides = [1, 1]} : vector<64x128xf32> to vector<8x128xf32>
    %39 = arith.truncf %37 : vector<8x32xf32> to vector<8x32xbf16>
    %cst_14 = arith.constant dense<0.000000e+00> : vector<8x128xf32>
    %40 = tpu.matmul %39, %8, %cst_14 {dimension_numbers = #tpu.dot_dimension_numbers<[1], [0], [0], [1], [0, 0, 1, 1], [], []>} : vector<8x32xbf16>, vector<32x128xbf16>, vector<8x128xf32> -> vector<8x128xf32>
    %41 = arith.addf %38, %40 : vector<8x128xf32>
    %cst_15 = arith.constant 5.000000e-01 : f32
    %42 = vector.broadcast %cst_15 : f32 to vector<8x128xf32>
    %43 = arith.mulf %41, %42 : vector<8x128xf32>
    %44 = arith.select %11, %43, %41 : vector<8x128xi1>, vector<8x128xf32>
    %45 = math.tanh %44 : vector<8x128xf32>
    %cst_16 = arith.constant 1.000000e+00 : f32
    %46 = vector.broadcast %cst_16 : f32 to vector<8x128xf32>
    %47 = arith.addf %45, %46 : vector<8x128xf32>
    %cst_17 = arith.constant 5.000000e-01 : f32
    %48 = vector.broadcast %cst_17 : f32 to vector<8x128xf32>
    %49 = arith.mulf %48, %47 : vector<8x128xf32>
    %50 = arith.select %11, %49, %45 : vector<8x128xi1>, vector<8x128xf32>
    %51 = vector.extract_strided_slice %50 {offsets = [0, 0], sizes = [8, 32], strides = [1, 1]} : vector<8x128xf32> to vector<8x32xf32>
    %52 = vector.extract_strided_slice %50 {offsets = [0, 32], sizes = [8, 32], strides = [1, 1]} : vector<8x128xf32> to vector<8x32xf32>
    %53 = vector.extract_strided_slice %50 {offsets = [0, 64], sizes = [8, 32], strides = [1, 1]} : vector<8x128xf32> to vector<8x32xf32>
    %54 = vector.extract_strided_slice %50 {offsets = [0, 96], sizes = [8, 32], strides = [1, 1]} : vector<8x128xf32> to vector<8x32xf32>
    %55 = arith.mulf %52, %35 : vector<8x32xf32>
    %56 = arith.mulf %51, %54 : vector<8x32xf32>
    %57 = arith.addf %55, %56 : vector<8x32xf32>
    %58 = math.tanh %57 : vector<8x32xf32>
    %59 = arith.mulf %53, %58 : vector<8x32xf32>
    %60 = vector.extract_strided_slice %7 {offsets = [16, 0], sizes = [8, 128], strides = [1, 1]} : vector<64x128xf32> to vector<8x128xf32>
    %61 = arith.truncf %59 : vector<8x32xf32> to vector<8x32xbf16>
    %cst_18 = arith.constant dense<0.000000e+00> : vector<8x128xf32>
    %62 = tpu.matmul %61, %8, %cst_18 {dimension_numbers = #tpu.dot_dimension_numbers<[1], [0], [0], [1], [0, 0, 1, 1], [], []>} : vector<8x32xbf16>, vector<32x128xbf16>, vector<8x128xf32> -> vector<8x128xf32>
    %63 = arith.addf %60, %62 : vector<8x128xf32>
    %cst_19 = arith.constant 5.000000e-01 : f32
    %64 = vector.broadcast %cst_19 : f32 to vector<8x128xf32>
    %65 = arith.mulf %63, %64 : vector<8x128xf32>
    %66 = arith.select %11, %65, %63 : vector<8x128xi1>, vector<8x128xf32>
    %67 = math.tanh %66 : vector<8x128xf32>
    %cst_20 = arith.constant 1.000000e+00 : f32
    %68 = vector.broadcast %cst_20 : f32 to vector<8x128xf32>
    %69 = arith.addf %67, %68 : vector<8x128xf32>
    %cst_21 = arith.constant 5.000000e-01 : f32
    %70 = vector.broadcast %cst_21 : f32 to vector<8x128xf32>
    %71 = arith.mulf %70, %69 : vector<8x128xf32>
    %72 = arith.select %11, %71, %67 : vector<8x128xi1>, vector<8x128xf32>
    %73 = vector.extract_strided_slice %72 {offsets = [0, 0], sizes = [8, 32], strides = [1, 1]} : vector<8x128xf32> to vector<8x32xf32>
    %74 = vector.extract_strided_slice %72 {offsets = [0, 32], sizes = [8, 32], strides = [1, 1]} : vector<8x128xf32> to vector<8x32xf32>
    %75 = vector.extract_strided_slice %72 {offsets = [0, 64], sizes = [8, 32], strides = [1, 1]} : vector<8x128xf32> to vector<8x32xf32>
    %76 = vector.extract_strided_slice %72 {offsets = [0, 96], sizes = [8, 32], strides = [1, 1]} : vector<8x128xf32> to vector<8x32xf32>
    %77 = arith.mulf %74, %57 : vector<8x32xf32>
    %78 = arith.mulf %73, %76 : vector<8x32xf32>
    %79 = arith.addf %77, %78 : vector<8x32xf32>
    %80 = math.tanh %79 : vector<8x32xf32>
    %81 = arith.mulf %75, %80 : vector<8x32xf32>
    %82 = vector.extract_strided_slice %7 {offsets = [24, 0], sizes = [8, 128], strides = [1, 1]} : vector<64x128xf32> to vector<8x128xf32>
    %83 = arith.truncf %81 : vector<8x32xf32> to vector<8x32xbf16>
    %cst_22 = arith.constant dense<0.000000e+00> : vector<8x128xf32>
    %84 = tpu.matmul %83, %8, %cst_22 {dimension_numbers = #tpu.dot_dimension_numbers<[1], [0], [0], [1], [0, 0, 1, 1], [], []>} : vector<8x32xbf16>, vector<32x128xbf16>, vector<8x128xf32> -> vector<8x128xf32>
    %85 = arith.addf %82, %84 : vector<8x128xf32>
    %cst_23 = arith.constant 5.000000e-01 : f32
    %86 = vector.broadcast %cst_23 : f32 to vector<8x128xf32>
    %87 = arith.mulf %85, %86 : vector<8x128xf32>
    %88 = arith.select %11, %87, %85 : vector<8x128xi1>, vector<8x128xf32>
    %89 = math.tanh %88 : vector<8x128xf32>
    %cst_24 = arith.constant 1.000000e+00 : f32
    %90 = vector.broadcast %cst_24 : f32 to vector<8x128xf32>
    %91 = arith.addf %89, %90 : vector<8x128xf32>
    %cst_25 = arith.constant 5.000000e-01 : f32
    %92 = vector.broadcast %cst_25 : f32 to vector<8x128xf32>
    %93 = arith.mulf %92, %91 : vector<8x128xf32>
    %94 = arith.select %11, %93, %89 : vector<8x128xi1>, vector<8x128xf32>
    %95 = vector.extract_strided_slice %94 {offsets = [0, 0], sizes = [8, 32], strides = [1, 1]} : vector<8x128xf32> to vector<8x32xf32>
    %96 = vector.extract_strided_slice %94 {offsets = [0, 32], sizes = [8, 32], strides = [1, 1]} : vector<8x128xf32> to vector<8x32xf32>
    %97 = vector.extract_strided_slice %94 {offsets = [0, 64], sizes = [8, 32], strides = [1, 1]} : vector<8x128xf32> to vector<8x32xf32>
    %98 = vector.extract_strided_slice %94 {offsets = [0, 96], sizes = [8, 32], strides = [1, 1]} : vector<8x128xf32> to vector<8x32xf32>
    %99 = arith.mulf %96, %79 : vector<8x32xf32>
    %100 = arith.mulf %95, %98 : vector<8x32xf32>
    %101 = arith.addf %99, %100 : vector<8x32xf32>
    %102 = math.tanh %101 : vector<8x32xf32>
    %103 = arith.mulf %97, %102 : vector<8x32xf32>
    %104 = vector.extract_strided_slice %7 {offsets = [32, 0], sizes = [8, 128], strides = [1, 1]} : vector<64x128xf32> to vector<8x128xf32>
    %105 = arith.truncf %103 : vector<8x32xf32> to vector<8x32xbf16>
    %cst_26 = arith.constant dense<0.000000e+00> : vector<8x128xf32>
    %106 = tpu.matmul %105, %8, %cst_26 {dimension_numbers = #tpu.dot_dimension_numbers<[1], [0], [0], [1], [0, 0, 1, 1], [], []>} : vector<8x32xbf16>, vector<32x128xbf16>, vector<8x128xf32> -> vector<8x128xf32>
    %107 = arith.addf %104, %106 : vector<8x128xf32>
    %cst_27 = arith.constant 5.000000e-01 : f32
    %108 = vector.broadcast %cst_27 : f32 to vector<8x128xf32>
    %109 = arith.mulf %107, %108 : vector<8x128xf32>
    %110 = arith.select %11, %109, %107 : vector<8x128xi1>, vector<8x128xf32>
    %111 = math.tanh %110 : vector<8x128xf32>
    %cst_28 = arith.constant 1.000000e+00 : f32
    %112 = vector.broadcast %cst_28 : f32 to vector<8x128xf32>
    %113 = arith.addf %111, %112 : vector<8x128xf32>
    %cst_29 = arith.constant 5.000000e-01 : f32
    %114 = vector.broadcast %cst_29 : f32 to vector<8x128xf32>
    %115 = arith.mulf %114, %113 : vector<8x128xf32>
    %116 = arith.select %11, %115, %111 : vector<8x128xi1>, vector<8x128xf32>
    %117 = vector.extract_strided_slice %116 {offsets = [0, 0], sizes = [8, 32], strides = [1, 1]} : vector<8x128xf32> to vector<8x32xf32>
    %118 = vector.extract_strided_slice %116 {offsets = [0, 32], sizes = [8, 32], strides = [1, 1]} : vector<8x128xf32> to vector<8x32xf32>
    %119 = vector.extract_strided_slice %116 {offsets = [0, 64], sizes = [8, 32], strides = [1, 1]} : vector<8x128xf32> to vector<8x32xf32>
    %120 = vector.extract_strided_slice %116 {offsets = [0, 96], sizes = [8, 32], strides = [1, 1]} : vector<8x128xf32> to vector<8x32xf32>
    %121 = arith.mulf %118, %101 : vector<8x32xf32>
    %122 = arith.mulf %117, %120 : vector<8x32xf32>
    %123 = arith.addf %121, %122 : vector<8x32xf32>
    %124 = math.tanh %123 : vector<8x32xf32>
    %125 = arith.mulf %119, %124 : vector<8x32xf32>
    %126 = vector.extract_strided_slice %7 {offsets = [40, 0], sizes = [8, 128], strides = [1, 1]} : vector<64x128xf32> to vector<8x128xf32>
    %127 = arith.truncf %125 : vector<8x32xf32> to vector<8x32xbf16>
    %cst_30 = arith.constant dense<0.000000e+00> : vector<8x128xf32>
    %128 = tpu.matmul %127, %8, %cst_30 {dimension_numbers = #tpu.dot_dimension_numbers<[1], [0], [0], [1], [0, 0, 1, 1], [], []>} : vector<8x32xbf16>, vector<32x128xbf16>, vector<8x128xf32> -> vector<8x128xf32>
    %129 = arith.addf %126, %128 : vector<8x128xf32>
    %cst_31 = arith.constant 5.000000e-01 : f32
    %130 = vector.broadcast %cst_31 : f32 to vector<8x128xf32>
    %131 = arith.mulf %129, %130 : vector<8x128xf32>
    %132 = arith.select %11, %131, %129 : vector<8x128xi1>, vector<8x128xf32>
    %133 = math.tanh %132 : vector<8x128xf32>
    %cst_32 = arith.constant 1.000000e+00 : f32
    %134 = vector.broadcast %cst_32 : f32 to vector<8x128xf32>
    %135 = arith.addf %133, %134 : vector<8x128xf32>
    %cst_33 = arith.constant 5.000000e-01 : f32
    %136 = vector.broadcast %cst_33 : f32 to vector<8x128xf32>
    %137 = arith.mulf %136, %135 : vector<8x128xf32>
    %138 = arith.select %11, %137, %133 : vector<8x128xi1>, vector<8x128xf32>
    %139 = vector.extract_strided_slice %138 {offsets = [0, 0], sizes = [8, 32], strides = [1, 1]} : vector<8x128xf32> to vector<8x32xf32>
    %140 = vector.extract_strided_slice %138 {offsets = [0, 32], sizes = [8, 32], strides = [1, 1]} : vector<8x128xf32> to vector<8x32xf32>
    %141 = vector.extract_strided_slice %138 {offsets = [0, 64], sizes = [8, 32], strides = [1, 1]} : vector<8x128xf32> to vector<8x32xf32>
    %142 = vector.extract_strided_slice %138 {offsets = [0, 96], sizes = [8, 32], strides = [1, 1]} : vector<8x128xf32> to vector<8x32xf32>
    %143 = arith.mulf %140, %123 : vector<8x32xf32>
    %144 = arith.mulf %139, %142 : vector<8x32xf32>
    %145 = arith.addf %143, %144 : vector<8x32xf32>
    %146 = math.tanh %145 : vector<8x32xf32>
    %147 = arith.mulf %141, %146 : vector<8x32xf32>
    %148 = vector.extract_strided_slice %7 {offsets = [48, 0], sizes = [8, 128], strides = [1, 1]} : vector<64x128xf32> to vector<8x128xf32>
    %149 = arith.truncf %147 : vector<8x32xf32> to vector<8x32xbf16>
    %cst_34 = arith.constant dense<0.000000e+00> : vector<8x128xf32>
    %150 = tpu.matmul %149, %8, %cst_34 {dimension_numbers = #tpu.dot_dimension_numbers<[1], [0], [0], [1], [0, 0, 1, 1], [], []>} : vector<8x32xbf16>, vector<32x128xbf16>, vector<8x128xf32> -> vector<8x128xf32>
    %151 = arith.addf %148, %150 : vector<8x128xf32>
    %cst_35 = arith.constant 5.000000e-01 : f32
    %152 = vector.broadcast %cst_35 : f32 to vector<8x128xf32>
    %153 = arith.mulf %151, %152 : vector<8x128xf32>
    %154 = arith.select %11, %153, %151 : vector<8x128xi1>, vector<8x128xf32>
    %155 = math.tanh %154 : vector<8x128xf32>
    %cst_36 = arith.constant 1.000000e+00 : f32
    %156 = vector.broadcast %cst_36 : f32 to vector<8x128xf32>
    %157 = arith.addf %155, %156 : vector<8x128xf32>
    %cst_37 = arith.constant 5.000000e-01 : f32
    %158 = vector.broadcast %cst_37 : f32 to vector<8x128xf32>
    %159 = arith.mulf %158, %157 : vector<8x128xf32>
    %160 = arith.select %11, %159, %155 : vector<8x128xi1>, vector<8x128xf32>
    %161 = vector.extract_strided_slice %160 {offsets = [0, 0], sizes = [8, 32], strides = [1, 1]} : vector<8x128xf32> to vector<8x32xf32>
    %162 = vector.extract_strided_slice %160 {offsets = [0, 32], sizes = [8, 32], strides = [1, 1]} : vector<8x128xf32> to vector<8x32xf32>
    %163 = vector.extract_strided_slice %160 {offsets = [0, 64], sizes = [8, 32], strides = [1, 1]} : vector<8x128xf32> to vector<8x32xf32>
    %164 = vector.extract_strided_slice %160 {offsets = [0, 96], sizes = [8, 32], strides = [1, 1]} : vector<8x128xf32> to vector<8x32xf32>
    %165 = arith.mulf %162, %145 : vector<8x32xf32>
    %166 = arith.mulf %161, %164 : vector<8x32xf32>
    %167 = arith.addf %165, %166 : vector<8x32xf32>
    %168 = math.tanh %167 : vector<8x32xf32>
    %169 = arith.mulf %163, %168 : vector<8x32xf32>
    %170 = vector.extract_strided_slice %7 {offsets = [56, 0], sizes = [8, 128], strides = [1, 1]} : vector<64x128xf32> to vector<8x128xf32>
    %171 = arith.truncf %169 : vector<8x32xf32> to vector<8x32xbf16>
    %cst_38 = arith.constant dense<0.000000e+00> : vector<8x128xf32>
    %172 = tpu.matmul %171, %8, %cst_38 {dimension_numbers = #tpu.dot_dimension_numbers<[1], [0], [0], [1], [0, 0, 1, 1], [], []>} : vector<8x32xbf16>, vector<32x128xbf16>, vector<8x128xf32> -> vector<8x128xf32>
    %173 = arith.addf %170, %172 : vector<8x128xf32>
    %cst_39 = arith.constant 5.000000e-01 : f32
    %174 = vector.broadcast %cst_39 : f32 to vector<8x128xf32>
    %175 = arith.mulf %173, %174 : vector<8x128xf32>
    %176 = arith.select %11, %175, %173 : vector<8x128xi1>, vector<8x128xf32>
    %177 = math.tanh %176 : vector<8x128xf32>
    %cst_40 = arith.constant 1.000000e+00 : f32
    %178 = vector.broadcast %cst_40 : f32 to vector<8x128xf32>
    %179 = arith.addf %177, %178 : vector<8x128xf32>
    %cst_41 = arith.constant 5.000000e-01 : f32
    %180 = vector.broadcast %cst_41 : f32 to vector<8x128xf32>
    %181 = arith.mulf %180, %179 : vector<8x128xf32>
    %182 = arith.select %11, %181, %177 : vector<8x128xi1>, vector<8x128xf32>
    %183 = vector.extract_strided_slice %182 {offsets = [0, 0], sizes = [8, 32], strides = [1, 1]} : vector<8x128xf32> to vector<8x32xf32>
    %184 = vector.extract_strided_slice %182 {offsets = [0, 32], sizes = [8, 32], strides = [1, 1]} : vector<8x128xf32> to vector<8x32xf32>
    %185 = vector.extract_strided_slice %182 {offsets = [0, 64], sizes = [8, 32], strides = [1, 1]} : vector<8x128xf32> to vector<8x32xf32>
    %186 = vector.extract_strided_slice %182 {offsets = [0, 96], sizes = [8, 32], strides = [1, 1]} : vector<8x128xf32> to vector<8x32xf32>
    %187 = arith.mulf %184, %167 : vector<8x32xf32>
    %188 = arith.mulf %183, %186 : vector<8x32xf32>
    %189 = arith.addf %187, %188 : vector<8x32xf32>
    %190 = math.tanh %189 : vector<8x32xf32>
    %191 = arith.mulf %185, %190 : vector<8x32xf32>
    %c0_42 = arith.constant 0 : index
    %c0_43 = arith.constant 0 : index
    %192 = vector.load %arg5[%c0_42, %c0_43] : memref<32x128xf32, #tpu.memory_space<vmem>>, vector<32x128xf32>
    %cst_44 = arith.constant dense<0.000000e+00> : vector<8x128xf32>
    %193 = tpu.matmul %191, %192, %cst_44 {dimension_numbers = #tpu.dot_dimension_numbers<[1], [0], [0], [1], [0, 0, 1, 1], [], []>} : vector<8x32xf32>, vector<32x128xf32>, vector<8x128xf32> -> vector<8x128xf32>
    %c0_45 = arith.constant 0 : index
    %c0_46 = arith.constant 0 : index
    %194 = vector.load %arg6[%c0_45, %c0_46] : memref<1x128xf32, #tpu.memory_space<vmem>>, vector<1x128xf32>
    %195 = vector.broadcast %194 : vector<1x128xf32> to vector<8x128xf32>
    %196 = arith.addf %193, %195 : vector<8x128xf32>
    %cst_47 = arith.constant -1.000000e+30 : f32
    %197 = vector.broadcast %cst_47 : f32 to vector<8x128xf32>
    %198 = arith.select %13, %196, %197 : vector<8x128xi1>, vector<8x128xf32>
    %cst_48 = arith.constant dense<0xFF800000> : vector<8xf32>
    %199 = vector.multi_reduction <maximumf>, %198, %cst_48 [1] : vector<8x128xf32> to vector<8xf32>
    %200 = vector.shape_cast %199 : vector<8xf32> to vector<8x1xf32>
    %201 = vector.broadcast %200 : vector<8x1xf32> to vector<8x128xf32>
    %202 = arith.subf %198, %201 : vector<8x128xf32>
    %203 = math.exp %202 : vector<8x128xf32>
    %cst_49 = arith.constant 0.000000e+00 : f32
    %204 = vector.broadcast %cst_49 : f32 to vector<8x128xf32>
    %205 = arith.select %13, %203, %204 : vector<8x128xi1>, vector<8x128xf32>
    %cst_50 = arith.constant dense<0.000000e+00> : vector<8xf32>
    %206 = vector.multi_reduction <add>, %205, %cst_50 [1] : vector<8x128xf32> to vector<8xf32>
    %207 = vector.shape_cast %206 : vector<8xf32> to vector<8x1xf32>
    %208 = vector.broadcast %207 : vector<8x1xf32> to vector<8x128xf32>
    %209 = arith.divf %205, %208 : vector<8x128xf32>
    %c0_51 = arith.constant 0 : index
    %c0_52 = arith.constant 0 : index
    %210 = vector.load %arg7[%c0_51, %c0_52] : memref<8x128xf32, #tpu.memory_space<vmem>>, vector<8x128xf32>
    tpu.vector_store %arg7[%c0_51, %c0_52], %209 {strides = array<i32>} : memref<8x128xf32, #tpu.memory_space<vmem>>, vector<8x128xf32>,
    return
  }
  func.func @transform_0(%arg0: i32) -> (i32, i32, i32) {
    %c0_i32 = arith.constant 0 : i32
    %c0_i32_0 = arith.constant 0 : i32
    %c0_i32_1 = arith.constant 0 : i32
    return %c0_i32, %arg0, %c0_i32_0 : i32, i32, i32
  }
  func.func @transform_1(%arg0: i32) -> (i32, i32) {
    %c0_i32 = arith.constant 0 : i32
    %c0_i32_0 = arith.constant 0 : i32
    %c0_i32_1 = arith.constant 0 : i32
    return %c0_i32, %c0_i32_0 : i32, i32
  }
  func.func @transform_2(%arg0: i32) -> (i32, i32) {
    %c0_i32 = arith.constant 0 : i32
    %c0_i32_0 = arith.constant 0 : i32
    %c0_i32_1 = arith.constant 0 : i32
    return %c0_i32, %c0_i32_0 : i32, i32
  }
  func.func @transform_3(%arg0: i32) -> (i32, i32) {
    %c0_i32 = arith.constant 0 : i32
    %c0_i32_0 = arith.constant 0 : i32
    %c0_i32_1 = arith.constant 0 : i32
    return %c0_i32, %c0_i32_0 : i32, i32
  }
  func.func @transform_4(%arg0: i32) -> (i32, i32) {
    %c0_i32 = arith.constant 0 : i32
    %c0_i32_0 = arith.constant 0 : i32
    %c0_i32_1 = arith.constant 0 : i32
    return %c0_i32, %c0_i32_0 : i32, i32
  }
  func.func @transform_5(%arg0: i32) -> (i32, i32) {
    %c0_i32 = arith.constant 0 : i32
    %c0_i32_0 = arith.constant 0 : i32
    %c0_i32_1 = arith.constant 0 : i32
    return %c0_i32, %c0_i32_0 : i32, i32
  }
  func.func @transform_6(%arg0: i32) -> (i32, i32) {
    %c0_i32 = arith.constant 0 : i32
    %c0_i32_0 = arith.constant 0 : i32
    return %arg0, %c0_i32 : i32, i32
  }
}

</mosaic_0001>

<bundles_post_ra>
// kernel: tpu_custom_call.1
= control target key start
LH: loop header
LB: loop body
LE: loop exit
PB: predicated region body
PF: predicated region fallthrough
CT: control target
= control target key end

     0   :  { %11 = vsyncpa [#allocation3], 0  ;;  %s1498_s0 = inlined_call_operand.hbm [shape: f32[8,8,10], index: 0, kind: input, shape index: {}]   ;;  %s1499_s1 = inlined_call_operand.hbm [shape: bf16[10,128], index: 1, kind: input, shape index: {}]   ;;  %s1500_s2 = inlined_call_operand.hbm [shape: bf16[32,128], index: 2, kind: input, shape index: {}]   ;;  %s1501_s3 = inlined_call_operand.vmem [shape: f32[1,128], index: 3, kind: input, shape index: {}]   ;;  %s1502_s4 = inlined_call_operand.hbm [shape: f32[32,128], index: 4, kind: input, shape index: {}]   ;;  %s1503_s5 = inlined_call_operand.vmem [shape: f32[1,128], index: 5, kind: input, shape index: {}]   ;;  %s1504_s6 = inlined_call_operand.hbm [shape: f32[8,128], index: 6, kind: output, shape index: {}]  }
   0x1   :  { %12 = vsyncpa [#allocation6], 0 }
   0x2   :  { %13 = vsyncpa [#allocation9], 0 }
   0x3   :  { %14 = vsyncpa [#allocation4], 0  ;;  %s1202_s21 = smov [#allocation5]   ;;  %s1084_s25 = scalar_lea.hbm %s1499_s1, 128 }
   0x4   :  { %s32_s22 = sshll.u32 %s1202_s21, 4  ;;  %p1085_p0 = scmp.ne.s32.totalorder %s1499_s1, %s1084_s25  ;;  %s33_s22 = int_to_ptr.vmem [resolvable:$true] %s32_s22 }
   0x5   :  { %p1088_p1 = scmp.lt.u32.totalorder %s1084_s25, %s1499_s1 }
   0x7   :  { %p1090_p2 = pnand %p1088_p1, %p1085_p0 }
   0x9   :  { %1093 = shalt.err (!%p1090_p2)
}
   0xa   :  { %s1094_s30 = scalar_lea.vmem %s33_s22, 128  ;;  %p1099_p4 = scmp.lt.s32.totalorder %s33_s22, %s33_s22 }
   0xb   :  { %p1095_p3 = scmp.ne.s32.totalorder %s33_s22, %s1094_s30  ;;  %p1100_p5 = scmp.lt.s32.totalorder %s1094_s30, %s1094_s30 }
   0xd   :  { %p1101_p6 = por %p1100_p5, %p1099_p4 }
   0xf   :  { %p1102_p7 = pnand %p1101_p6, %p1095_p3 }
  0x11   :  { %1105 = shalt.err (!%p1102_p7)
}
  0x12   :  { %s1203_s7 = smov 64   ;;  %s1204_s8 = smov 4  }
  0x13   :  { %38 = dma.hbm_to_vmem [thread:$0]  %s1499_s1, 128, %s33_s22, [#allocation6], %s1203_s7, %s1203_s7, %s1204_s8  }
  0x14   :  { %s1205_s11 = smov [#allocation2]   ;;  %s1106_s15 = scalar_lea.hbm %s1498_s0, 1024 }
  0x15   :  { %s20_s12 = sshll.u32 %s1205_s11, 4  ;;  %p1107_p8 = scmp.ne.s32.totalorder %s1498_s0, %s1106_s15  ;;  %s21_s12 = int_to_ptr.vmem [resolvable:$true] %s20_s12 }
  0x16   :  { %p1110_p9 = scmp.lt.u32.totalorder %s1106_s15, %s1498_s0 }
  0x18   :  { %p1112_p10 = pnand %p1110_p9, %p1107_p8 }
  0x1a   :  { %1115 = shalt.err (!%p1112_p10)
}
  0x1b   :  { %s1116_s20 = scalar_lea.vmem %s21_s12, 1024  ;;  %p1121_p12 = scmp.lt.s32.totalorder %s21_s12, %s21_s12 }
  0x1c   :  { %p1117_p11 = scmp.ne.s32.totalorder %s21_s12, %s1116_s20  ;;  %p1122_p13 = scmp.lt.s32.totalorder %s1116_s20, %s1116_s20 }
  0x1e   :  { %p1123_p0 = por %p1122_p13, %p1121_p12 }
  0x20   :  { %p1124_p1 = pnand %p1123_p0, %p1117_p11 }
  0x22   :  { %1127 = shalt.err (!%p1124_p1)
}
  0x23   :  { %s1206_s1 = smov 128   ;;  %s1207_s21 = smov 8  }
  0x24   :  { %26 = dma.hbm_to_vmem [thread:$0]  %s1498_s0, 1024, %s21_s12, [#allocation3], %s1206_s1, %s1206_s1, %s1207_s21  }
  0x25   :  { %s1208_s24 = smov [#allocation7]   ;;  %s1209_s26 = smov [#allocation8]  }
  0x26   :  { %s44_s25 = sshll.u32 %s1208_s24, 4  ;;  %s58_s27 = sshll.u32 %s1209_s26, 4  ;;  %s45_s25 = int_to_ptr.vmem [resolvable:$true] %s44_s25  ;;  %s1281_s27 = int_to_ptr.vmem [resolvable:$true] %s58_s27 }
  0x27   :  { %s1128_s30 = scalar_lea.hbm %s1500_s2, 256 }
  0x28   :  { %p1129_p2 = scmp.ne.s32.totalorder %s1500_s2, %s1128_s30  ;;  %p1132_p3 = scmp.lt.u32.totalorder %s1128_s30, %s1500_s2 }
  0x2a   :  { %p1134_p4 = pnand %p1132_p3, %p1129_p2 }
  0x2c   :  { %1137 = shalt.err (!%p1134_p4)
}
  0x2d   :  { %s1138_s0 = scalar_lea.vmem %s45_s25, 256  ;;  %p1143_p6 = scmp.lt.s32.totalorder %s45_s25, %s45_s25 }
  0x2e   :  { %p1139_p5 = scmp.ne.s32.totalorder %s45_s25, %s1138_s0  ;;  %p1144_p7 = scmp.lt.s32.totalorder %s1138_s0, %s1138_s0 }
  0x30   :  { %p1145_p8 = por %p1144_p7, %p1143_p6 }
  0x32   :  { %p1146_p9 = pnand %p1145_p8, %p1139_p5 }
  0x34   :  { %1149 = shalt.err (!%p1146_p9)
}
  0x35   :  { %50 = dma.hbm_to_vmem [thread:$0]  %s1500_s2, 256, %s45_s25, [#allocation6], %s1203_s7, %s1203_s7, %s1204_s8  }
  0x36   :  { %s1150_s17 = scalar_lea.hbm %s1502_s4, 512 }
  0x37   :  { %p1151_p10 = scmp.ne.s32.totalorder %s1502_s4, %s1150_s17  ;;  %p1154_p11 = scmp.lt.u32.totalorder %s1150_s17, %s1502_s4 }
  0x39   :  { %p1156_p12 = pnand %p1154_p11, %p1151_p10 }
  0x3b   :  { %1159 = shalt.err (!%p1156_p12)
}
  0x3c   :  { %s1160_s23 = scalar_lea.vmem %s1281_s27, 512  ;;  %p1165_p0 = scmp.lt.s32.totalorder %s1281_s27, %s1281_s27 }
  0x3d   :  { %p1161_p13 = scmp.ne.s32.totalorder %s1281_s27, %s1160_s23  ;;  %p1166_p1 = scmp.lt.s32.totalorder %s1160_s23, %s1160_s23 }
  0x3f   :  { %p1167_p2 = por %p1166_p1, %p1165_p0 }
  0x41   :  { %p1168_p3 = pnand %p1167_p2, %p1161_p13 }
  0x43   :  { %1171 = shalt.err (!%p1168_p3)
}
  0x44   :  { %64 = dma.hbm_to_vmem [thread:$0]  %s1502_s4, 512, %s1281_s27, [#allocation9], %s1206_s1, %s1206_s1, %s1207_s21  }
  0x45   :  { %1194 = dma.done.wait [#allocation3], 1024  }
  0x46   :  { %1195 = vsyncadd [#allocation3], 4294966272 }
  0x47   :  { %1196 = dma.done.wait [#allocation6], 384  }
  0x48   :  { %1197 = vsyncadd [#allocation6], 4294966912 }
  0x49   :  { %1198 = dma.done.wait [#allocation9], 512  }
  0x4a   :  { %1199 = vsyncadd [#allocation9], 4294966784  ;;  %v1210_v0 = vmov 0.0   ;;  %vm1211_vm0 = vmmov 0   ;;  %vm119_vm1 = vcmask 1044480   ;;  %v1321_v2 = vld [vmem:[#allocation7] sm:$0xff]   ;;  %v192_v12 = vlaneseq }
  0x4b   :  { %949 = vmatprep.subr.bf16.mxu1 %v1210_v0  ;;  %953 = vmatprep.mubr.msk.bf16.mxu1 %vm1211_vm0, %v1210_v0  ;;  %v1045_v1 = vld [vmem:[#allocation5] sm:$0x1f]   ;;  %v81_v5 = vld [vmem:[#allocation2 + $0x8] sm:$0xff]  ;;  %vm106_vm2 = vcmask 80896   ;;  %v82_v6 = vld [vmem:[#allocation2 + $0x10] sm:$0xff]  ;;  %v1212_v11 = vmov 0  }
  0x4c   :  { %1030 = vmatprep.subr.msk.bf16.mxu0 %vm119_vm1, %v1045_v1  ;;  %v121_v3 = vsel %vm119_vm1, %v1045_v1, 0  ;;  %v80_v4 = vld [vmem:[#allocation2] sm:$0xff]  ;;  %950 = vmatpush3.bf16.msra.mxu1 %v1321_v2  ;;  %v83_v8 = vld [vmem:[#allocation2 + $0x18] sm:$0xff]  ;;  %v1325_v10 = vld [vmem:[#allocation7 + $0x8] sm:$0xff]   ;;  %v1352_v18 = vand.u32 127, %v192_v12  ;;  %vm208_vm4 = vcmask 261120  }
  0x4d   :  { %940 = vmatpush3.bf16.msra.mxu0 %v121_v3  ;;  %v88_v7 = vpack.c.bf16 %v81_v5, %v80_v4  ;;  %951 = vmatprep.subr.bf16.mxu1 %v1210_v0  ;;  %v89_v9 = vpack.c.bf16 %v83_v8, %v82_v6  ;;  %v1345_v13 = vld [vmem:[%s1501_s3] ss:$0 sm:$0xff]  ;;  %s1213_s3 = smov 32   ;;  %v85_v59 = vld [vmem:[#allocation2 + $0x28] sm:$0xff]  ;;  %v86_v60 = vld [vmem:[#allocation2 + $0x30] sm:$0xff] }
  0x4e   :  { %965 = vmatprep.subr.bf16.mxu0 %v1210_v0  ;;  %vm194_vm3 = vcmp.lt.s32.totalorder %v1352_v18, 96  ;;  %v84_v58 = vld [vmem:[#allocation2 + $0x20] sm:$0xff]  ;;  %v87_v62 = vld [vmem:[#allocation2 + $0x38] sm:$0xff]  ;;  %vm195_vm5 = vcmp.lt.s32.totalorder %v1352_v18, 4 }
  0x4f   :  { %941 = vmatprep.mubr.msk.bf16.mxu0 %vm106_vm2, %v88_v7  ;;  %v90_v61 = vpack.c.bf16 %v85_v59, %v84_v58  ;;  %v91_v63 = vpack.c.bf16 %v87_v62, %v86_v60 }
  0x50   :  { %942 = vmatmul.mubr.msk.bf16.vlgmr.msra.gmra.mrb[0].mxu0 %vm106_vm2, %v89_v9  ;;  %952 = vmatpush3.bf16.msra.mxu1 %v1325_v10 }
  0x51   :  { %966 = vmatpush3.bf16.msra.mxu0 %v1321_v2  ;;  %957 = vmatprep.subr.bf16.mxu1 %v1210_v0 }
  0x52   :  { %967 = vmatprep.subr.bf16.mxu0 %v1210_v0  ;;  %945 = vmatprep.mubr.msk.bf16.mxu0 %vm106_vm2, %v90_v61 }
  0x53   :  { %954 = vmatmul.mubr.bf16.vlgmr.msra.gmra.mrb[0].mxu1 %v1212_v11 }
  0x54   :  { %958 = vmatpush3.bf16.msra.mxu1 %v1321_v2  ;;  %961 = vmatprep.mubr.msk.bf16.mxu1 %vm1211_vm0, %v1210_v0 }
  0x55   :  { %959 = vmatprep.subr.bf16.mxu1 %v1210_v0  ;;  %968 = vmatpush3.bf16.msra.mxu0 %v1325_v10 }
  0x56   :  { %981 = vmatprep.subr.bf16.mxu0 %v1210_v0 }
  0x58   :  { %960 = vmatpush3.bf16.msra.mxu1 %v1325_v10  ;;  %946 = vmatmul.mubr.msk.bf16.gmra.mrb[4].mxu0 %vm106_vm2, %v91_v63 }
  0x59   :  { %973 = vmatprep.subr.bf16.mxu1 %v1210_v0  ;;  %969 = vmatprep.mubr.msk.bf16.mxu0 %vm1211_vm0, %v1210_v0 }
 0x123   :  { %v1347_v14 = vpop.f32.mrb[0].mxu0 }
 0x124   :  { %v157_v15 = vpop.f32.mrb[1].mxu0  ;;  %v166_v12 = vadd.f32 %v1347_v14, %v1345_v13 }
 0x125   :  { %v158_v16 = vadd.f32 %v1345_v13, %v157_v15  ;;  %v1350_v17 = vpop.f32.mrb[2].mxu0 }
 0x126   :  { %v160_v19 = vpop.f32.mrb[3].mxu0  ;;  %v246_v20 = vpop.f32.mrb[0].mxu1 }
 0x127   :  { %v252_v21 = vadd.f32 %v246_v20, %v158_v16  ;;  %v955_v22 = vpop.f32.mrb[1].mxu1  ;;  %v161_v41 = vadd.f32 %v1345_v13, %v160_v19 }
 0x128   :  { %v249_v23 = vpop.f32.mrb[2].mxu1 }
 0x129   :  { %v253_v24 = vmul.f32 0.5, %v252_v21  ;;  %v956_v25 = vpop.f32.mrb[3].mxu1 }
 0x12b   :  { %v254_v26 = vsel %vm194_vm3, %v253_v24, %v252_v21  ;;  %v1383_v6 = vpop.f32.mrb[4].mxu0 }
 0x12c   :  { %1048 = vtanh.f32 %v254_v26  ;;  %v1385_v7 = vpop.f32.mrb[5].mxu0 }
 0x12d   :  { %v1387_v8 = vpop.f32.mrb[6].mxu0  ;;  %v174_v58 = vadd.f32 %v1345_v13, %v1385_v7 }
 0x12e   :  { %v1389_v9 = vpop.f32.mrb[7].mxu0 }
 0x136   :  { %v1049_v27 = vpop.eup %1048 }
 0x137   :  { %v256_v28 = vadd.f32 1.0, %v1049_v27 }
 0x139   :  { %v257_v29 = vmul.f32 0.5, %v256_v28 }
 0x13b   :  { %v258_v30 = vsel %vm194_vm3, %v257_v29, %v1049_v27 }
 0x13c   :  { %261 = vrot.lane.b32.xlu0 %v258_v30, %s1213_s3  ;;  %v259_v33 = vmul.f32 0.0, %v258_v30 }
 0x1ae   :  { %v262_v31 = vpop.permute.xlu0 %261 }
 0x1af   :  { %v264_v32 = vmul.f32 %v262_v31, %v258_v30 }
 0x1b1   :  { %266 = vrot.lane.b32.xlu0 %v264_v32, %s1213_s3 }
 0x223   :  { %v267_v34 = vpop.permute.xlu0 %266 }
 0x224   :  { %v269_v35 = vadd.f32 %v267_v34, %v259_v33 }
 0x226   :  { %1050 = vtanh.f32 %v269_v35 }
 0x230   :  { %v1051_v36 = vpop.eup %1050 }
 0x231   :  { %272 = vrot.lane.b32.xlu1 %v1051_v36, %s1213_s3 }
 0x2a3   :  { %v273_v37 = vpop.permute.xlu1 %272 }
 0x2a4   :  { %v275_v38 = vmul.f32 %v273_v37, %v258_v30  ;;  %v169_v37 = vadd.f32 %v1350_v17, %v1345_v13 }
 0x2a6   :  { %v276_v39 = vpack.c.bf16 %v275_v38, %v275_v38 }
 0x2a8   :  { %278 = vrot.lane.b32.xlu1 %v276_v39, %s1203_s7 }
 0x31a   :  { %v279_v40 = vpop.permute.xlu1 %278 }
 0x31b   :  { %962 = vmatmul.mubr.msk.bf16.vlgmr.msra.gmra.mrb[4].mxu1 %vm208_vm4, %v279_v40 }
 0x31c   :  { %974 = vmatpush3.bf16.msra.mxu1 %v1321_v2  ;;  %977 = vmatprep.mubr.msk.bf16.mxu1 %vm1211_vm0, %v1210_v0 }
 0x31d   :  { %975 = vmatprep.subr.bf16.mxu1 %v1210_v0 }
 0x320   :  { %976 = vmatpush3.bf16.msra.mxu1 %v1325_v10 }
 0x321   :  { %989 = vmatprep.subr.bf16.mxu1 %v1210_v0 }
 0x3ee   :  { %v317_v42 = vpop.f32.mrb[4].mxu1 }
 0x3ef   :  { %v323_v43 = vadd.f32 %v317_v42, %v161_v41  ;;  %v963_v44 = vpop.f32.mrb[5].mxu1 }
 0x3f0   :  { %v320_v45 = vpop.f32.mrb[6].mxu1 }
 0x3f1   :  { %v324_v46 = vmul.f32 0.5, %v323_v43  ;;  %v964_v47 = vpop.f32.mrb[7].mxu1 }
 0x3f3   :  { %v325_v48 = vsel %vm194_vm3, %v324_v46, %v323_v43 }
 0x3f4   :  { %1052 = vtanh.f32 %v325_v48 }
 0x3fe   :  { %v1053_v49 = vpop.eup %1052 }
 0x3ff   :  { %v327_v50 = vadd.f32 1.0, %v1053_v49 }
 0x401   :  { %v328_v51 = vmul.f32 0.5, %v327_v50 }
 0x403   :  { %v329_v52 = vsel %vm194_vm3, %v328_v51, %v1053_v49 }
 0x404   :  { %332 = vrot.lane.b32.xlu0 %v329_v52, %s1213_s3  ;;  %v330_v55 = vmul.f32 %v329_v52, %v269_v35 }
 0x476   :  { %v333_v53 = vpop.permute.xlu0 %332 }
 0x477   :  { %v335_v54 = vmul.f32 %v333_v53, %v329_v52 }
 0x479   :  { %337 = vrot.lane.b32.xlu1 %v335_v54, %s1213_s3 }
 0x4eb   :  { %v338_v56 = vpop.permute.xlu1 %337 }
 0x4ec   :  { %v340_v57 = vadd.f32 %v338_v56, %v330_v55 }
 0x4ee   :  { %1054 = vtanh.f32 %v340_v57 }
 0x4f8   :  { %v1055_v1 = vpop.eup %1054 }
 0x4f9   :  { %343 = vrot.lane.b32.xlu0 %v1055_v1, %s1213_s3 }
 0x56b   :  { %v344_v3 = vpop.permute.xlu0 %343 }
 0x56c   :  { %v346_v4 = vmul.f32 %v344_v3, %v329_v52 }
 0x56e   :  { %v347_v5 = vpack.c.bf16 %v346_v4, %v346_v4 }
 0x570   :  { %349 = vrot.lane.b32.xlu1 %v347_v5, %s1203_s7 }
 0x5e2   :  { %v350_v11 = vpop.permute.xlu1 %349 }
 0x5e3   :  { %970 = vmatmul.mubr.msk.bf16.vlgmr.msra.gmra.mrb[8].mxu0 %vm208_vm4, %v350_v11 }
 0x5e4   :  { %982 = vmatpush3.bf16.msra.mxu0 %v1321_v2  ;;  %985 = vmatprep.mubr.msk.bf16.mxu0 %vm1211_vm0, %v1210_v0 }
 0x5e5   :  { %983 = vmatprep.subr.bf16.mxu0 %v1210_v0 }
 0x5e8   :  { %984 = vmatpush3.bf16.msra.mxu0 %v1325_v10 }
 0x5e9   :  { %997 = vmatprep.subr.bf16.mxu0 %v1210_v0 }
 0x6b6   :  { %v388_v15 = vpop.f32.mrb[8].mxu0 }
 0x6b7   :  { %v394_v16 = vadd.f32 %v388_v15, %v166_v12  ;;  %v971_v19 = vpop.f32.mrb[9].mxu0 }
 0x6b8   :  { %v391_v20 = vpop.f32.mrb[10].mxu0 }
 0x6b9   :  { %v395_v21 = vmul.f32 0.5, %v394_v16  ;;  %v972_v22 = vpop.f32.mrb[11].mxu0 }
 0x6bb   :  { %v396_v23 = vsel %vm194_vm3, %v395_v21, %v394_v16 }
 0x6bc   :  { %1056 = vtanh.f32 %v396_v23 }
 0x6c6   :  { %v1057_v24 = vpop.eup %1056 }
 0x6c7   :  { %v398_v25 = vadd.f32 1.0, %v1057_v24 }
 0x6c9   :  { %v399_v26 = vmul.f32 0.5, %v398_v25 }
 0x6cb   :  { %v400_v27 = vsel %vm194_vm3, %v399_v26, %v1057_v24  ;;  %v177_v26 = vadd.f32 %v1345_v13, %v1389_v9 }
 0x6cc   :  { %403 = vrot.lane.b32.xlu0 %v400_v27, %s1213_s3  ;;  %v401_v29 = vmul.f32 %v400_v27, %v340_v57 }
 0x73e   :  { %v404_v28 = vpop.permute.xlu0 %403 }
 0x73f   :  { %v406_v14 = vmul.f32 %v404_v28, %v400_v27 }
 0x741   :  { %408 = vrot.lane.b32.xlu1 %v406_v14, %s1213_s3 }
 0x7b3   :  { %v409_v30 = vpop.permute.xlu1 %408 }
 0x7b4   :  { %v411_v31 = vadd.f32 %v409_v30, %v401_v29 }
 0x7b6   :  { %1058 = vtanh.f32 %v411_v31 }
 0x7c0   :  { %v1059_v32 = vpop.eup %1058 }
 0x7c1   :  { %414 = vrot.lane.b32.xlu0 %v1059_v32, %s1213_s3 }
 0x833   :  { %v415_v33 = vpop.permute.xlu0 %414 }
 0x834   :  { %v417_v34 = vmul.f32 %v415_v33, %v400_v27 }
 0x836   :  { %v418_v35 = vpack.c.bf16 %v417_v34, %v417_v34 }
 0x838   :  { %420 = vrot.lane.b32.xlu1 %v418_v35, %s1203_s7 }
 0x8aa   :  { %v421_v36 = vpop.permute.xlu1 %420 }
 0x8ab   :  { %978 = vmatmul.mubr.msk.bf16.vlgmr.msra.gmra.mrb[8].mxu1 %vm208_vm4, %v421_v36 }
 0x8ac   :  { %990 = vmatpush3.bf16.msra.mxu1 %v1321_v2  ;;  %993 = vmatprep.mubr.msk.bf16.mxu1 %vm1211_vm0, %v1210_v0 }
 0x8ad   :  { %991 = vmatprep.subr.bf16.mxu1 %v1210_v0 }
 0x8b0   :  { %992 = vmatpush3.bf16.msra.mxu1 %v1325_v10 }
 0x8b1   :  { %1005 = vmatprep.subr.bf16.mxu1 %v1210_v0 }
 0x97e   :  { %v459_v38 = vpop.f32.mrb[8].mxu1 }
 0x97f   :  { %v465_v39 = vadd.f32 %v459_v38, %v169_v37  ;;  %v979_v40 = vpop.f32.mrb[9].mxu1 }
 0x980   :  { %v462_v41 = vpop.f32.mrb[10].mxu1 }
 0x981   :  { %v466_v42 = vmul.f32 0.5, %v465_v39  ;;  %v980_v43 = vpop.f32.mrb[11].mxu1 }
 0x983   :  { %v467_v44 = vsel %vm194_vm3, %v466_v42, %v465_v39 }
 0x984   :  { %1060 = vtanh.f32 %v467_v44  ;;  %v182_v44 = vadd.f32 %v1383_v6, %v1345_v13 }
 0x98e   :  { %v1061_v45 = vpop.eup %1060 }
 0x98f   :  { %v469_v46 = vadd.f32 1.0, %v1061_v45 }
 0x991   :  { %v470_v47 = vmul.f32 0.5, %v469_v46 }
 0x993   :  { %v471_v48 = vsel %vm194_vm3, %v470_v47, %v1061_v45 }
 0x994   :  { %474 = vrot.lane.b32.xlu0 %v471_v48, %s1213_s3  ;;  %v472_v50 = vmul.f32 %v471_v48, %v411_v31 }
 0xa06   :  { %v475_v49 = vpop.permute.xlu0 %474 }
 0xa07   :  { %v477_v17 = vmul.f32 %v475_v49, %v471_v48 }
 0xa09   :  { %479 = vrot.lane.b32.xlu1 %v477_v17, %s1213_s3 }
 0xa7b   :  { %v480_v51 = vpop.permute.xlu1 %479 }
 0xa7c   :  { %v482_v52 = vadd.f32 %v480_v51, %v472_v50 }
 0xa7e   :  { %1062 = vtanh.f32 %v482_v52 }
 0xa88   :  { %v1063_v53 = vpop.eup %1062 }
 0xa89   :  { %485 = vrot.lane.b32.xlu0 %v1063_v53, %s1213_s3 }
 0xafb   :  { %v486_v54 = vpop.permute.xlu0 %485 }
 0xafc   :  { %v488_v55 = vmul.f32 %v486_v54, %v471_v48 }
 0xafe   :  { %v489_v56 = vpack.c.bf16 %v488_v55, %v488_v55 }
 0xb00   :  { %491 = vrot.lane.b32.xlu1 %v489_v56, %s1203_s7 }
 0xb72   :  { %v492_v57 = vpop.permute.xlu1 %491 }
 0xb73   :  { %986 = vmatmul.mubr.msk.bf16.vlgmr.msra.gmra.mrb[12].mxu0 %vm208_vm4, %v492_v57 }
 0xb74   :  { %998 = vmatpush3.bf16.msra.mxu0 %v1321_v2  ;;  %1001 = vmatprep.mubr.msk.bf16.mxu0 %vm1211_vm0, %v1210_v0 }
 0xb75   :  { %999 = vmatprep.subr.bf16.mxu0 %v1210_v0 }
 0xb78   :  { %1000 = vmatpush3.bf16.msra.mxu0 %v1325_v10 }
 0xc46   :  { %v530_v59 = vpop.f32.mrb[12].mxu0 }
 0xc47   :  { %v536_v60 = vadd.f32 %v530_v59, %v174_v58  ;;  %v987_v61 = vpop.f32.mrb[13].mxu0 }
 0xc48   :  { %v533_v62 = vpop.f32.mrb[14].mxu0 }
 0xc49   :  { %v537_v63 = vmul.f32 0.5, %v536_v60  ;;  %v988_v1 = vpop.f32.mrb[15].mxu0 }
 0xc4b   :  { %v538_v3 = vsel %vm194_vm3, %v537_v63, %v536_v60  ;;  %v185_v63 = vadd.f32 %v1387_v8, %v1345_v13 }
 0xc4c   :  { %1064 = vtanh.f32 %v538_v3 }
 0xc56   :  { %v1065_v4 = vpop.eup %1064 }
 0xc57   :  { %v540_v5 = vadd.f32 1.0, %v1065_v4 }
 0xc59   :  { %v541_v11 = vmul.f32 0.5, %v540_v5 }
 0xc5b   :  { %v542_v12 = vsel %vm194_vm3, %v541_v11, %v1065_v4 }
 0xc5c   :  { %545 = vrot.lane.b32.xlu0 %v542_v12, %s1213_s3  ;;  %v543_v16 = vmul.f32 %v542_v12, %v482_v52 }
 0xcce   :  { %v546_v15 = vpop.permute.xlu0 %545 }
 0xccf   :  { %v548_v7 = vmul.f32 %v546_v15, %v542_v12 }
 0xcd1   :  { %550 = vrot.lane.b32.xlu1 %v548_v7, %s1213_s3 }
 0xd43   :  { %v551_v19 = vpop.permute.xlu1 %550 }
 0xd44   :  { %v553_v20 = vadd.f32 %v551_v19, %v543_v16 }
 0xd46   :  { %1066 = vtanh.f32 %v553_v20 }
 0xd50   :  { %v1067_v21 = vpop.eup %1066 }
 0xd51   :  { %556 = vrot.lane.b32.xlu0 %v1067_v21, %s1213_s3 }
 0xdc3   :  { %v557_v22 = vpop.permute.xlu0 %556 }
 0xdc4   :  { %v559_v23 = vmul.f32 %v557_v22, %v542_v12 }
 0xdc6   :  { %v560_v24 = vpack.c.bf16 %v559_v23, %v559_v23 }
 0xdc8   :  { %562 = vrot.lane.b32.xlu1 %v560_v24, %s1203_s7  ;;  %v773_v24 = vld [vmem:[#allocation8] sm:$0xff] }
 0xe3a   :  { %v563_v25 = vpop.permute.xlu1 %562 }
 0xe3b   :  { %994 = vmatmul.mubr.msk.bf16.vlgmr.msra.gmra.mrb[12].mxu1 %vm208_vm4, %v563_v25  ;;  %v774_v25 = vld [vmem:[#allocation8 + $0x8] sm:$0xff] }
 0xe3c   :  { %1006 = vmatpush3.bf16.msra.mxu1 %v1321_v2  ;;  %1009 = vmatprep.mubr.msk.bf16.mxu1 %vm1211_vm0, %v1210_v0 }
 0xe3d   :  { %1007 = vmatprep.subr.bf16.mxu1 %v1210_v0 }
 0xe40   :  { %1008 = vmatpush3.bf16.msra.mxu1 %v1325_v10 }
 0xf0e   :  { %v601_v27 = vpop.f32.mrb[12].mxu1 }
 0xf0f   :  { %v607_v28 = vadd.f32 %v601_v27, %v177_v26  ;;  %v995_v14 = vpop.f32.mrb[13].mxu1  ;;  %v775_v26 = vld [vmem:[#allocation8 + $0x10] sm:$0xff]  ;;  %v1214_v27 = vmov 0.0|0.0  }
 0xf10   :  { %v604_v29 = vpop.f32.mrb[14].mxu1  ;;  %1024 = vmatprep.subr.bf16.mxu0 %v1214_v27  ;;  %v776_v14 = vld [vmem:[#allocation8 + $0x18] sm:$0xff] }
 0xf11   :  { %v608_v30 = vmul.f32 0.5, %v607_v28  ;;  %v996_v31 = vpop.f32.mrb[15].mxu1  ;;  %v1028_v29 = vpack.c.bf16 %v776_v14, %v775_v26 }
 0xf13   :  { %v609_v32 = vsel %vm194_vm3, %v608_v30, %v607_v28  ;;  %v1025_v28 = vpack.c.bf16 %v774_v25, %v773_v24 }
 0xf14   :  { %1068 = vtanh.f32 %v609_v32 }
 0xf1e   :  { %v1069_v2 = vpop.eup %1068 }
 0xf1f   :  { %v611_v33 = vadd.f32 1.0, %v1069_v2 }
 0xf21   :  { %v612_v34 = vmul.f32 0.5, %v611_v33  ;;  %v903_v33 = vld [vmem:[%s1503_s5] ss:$0 sm:$0xff] }
 0xf23   :  { %v613_v35 = vsel %vm194_vm3, %v612_v34, %v1069_v2 }
 0xf24   :  { %616 = vrot.lane.b32.xlu0 %v613_v35, %s1213_s3  ;;  %v614_v36 = vmul.f32 %v613_v35, %v553_v20 }
 0xf96   :  { %v617_v10 = vpop.permute.xlu0 %616 }
 0xf97   :  { %v619_v9 = vmul.f32 %v617_v10, %v613_v35 }
 0xf99   :  { %621 = vrot.lane.b32.xlu1 %v619_v9, %s1213_s3 }
0x100b   :  { %v622_v37 = vpop.permute.xlu1 %621 }
0x100c   :  { %v624_v38 = vadd.f32 %v622_v37, %v614_v36 }
0x100e   :  { %1070 = vtanh.f32 %v624_v38 }
0x1018   :  { %v1071_v39 = vpop.eup %1070 }
0x1019   :  { %627 = vrot.lane.b32.xlu0 %v1071_v39, %s1213_s3 }
0x108b   :  { %v628_v40 = vpop.permute.xlu0 %627 }
0x108c   :  { %v630_v41 = vmul.f32 %v628_v40, %v613_v35 }
0x108e   :  { %v631_v42 = vpack.c.bf16 %v630_v41, %v630_v41 }
0x1090   :  { %633 = vrot.lane.b32.xlu1 %v631_v42, %s1203_s7 }
0x1102   :  { %v634_v43 = vpop.permute.xlu1 %633 }
0x1103   :  { %1002 = vmatmul.mubr.msk.bf16.vlgmr.msra.gmra.mrb[16].mxu0 %vm208_vm4, %v634_v43 }
0x1104   :  { %1021 = vmatprep.mubr.msk.f32.mxu0 %vm1211_vm0, %v1210_v0  ;;  %1026 = vmatpush3.bf16.msra.mxu0 %v1025_v28 }
0x1105   :  { %1027 = vmatprep.subr.bf16.mxu0 %v1214_v27 }
0x1108   :  { %1029 = vmatpush3.bf16.msra.mxu0 %v1028_v29 }
0x11d6   :  { %v672_v45 = vpop.f32.mrb[16].mxu0 }
0x11d7   :  { %v678_v46 = vadd.f32 %v672_v45, %v182_v44  ;;  %v1003_v47 = vpop.f32.mrb[17].mxu0 }
0x11d8   :  { %v675_v48 = vpop.f32.mrb[18].mxu0 }
0x11d9   :  { %v679_v49 = vmul.f32 0.5, %v678_v46  ;;  %v1004_v17 = vpop.f32.mrb[19].mxu0 }
0x11db   :  { %v680_v50 = vsel %vm194_vm3, %v679_v49, %v678_v46 }
0x11dc   :  { %1072 = vtanh.f32 %v680_v50 }
0x11e6   :  { %v1073_v51 = vpop.eup %1072 }
0x11e7   :  { %v682_v52 = vadd.f32 1.0, %v1073_v51 }
0x11e9   :  { %v683_v53 = vmul.f32 0.5, %v682_v52 }
0x11eb   :  { %v684_v54 = vsel %vm194_vm3, %v683_v53, %v1073_v51 }
0x11ec   :  { %687 = vrot.lane.b32.xlu0 %v684_v54, %s1213_s3  ;;  %v685_v55 = vmul.f32 %v684_v54, %v624_v38 }
0x125e   :  { %v688_v0 = vpop.permute.xlu0 %687 }
0x125f   :  { %v690_v6 = vmul.f32 %v688_v0, %v684_v54 }
0x1261   :  { %692 = vrot.lane.b32.xlu1 %v690_v6, %s1213_s3 }
0x12d3   :  { %v693_v56 = vpop.permute.xlu1 %692 }
0x12d4   :  { %v695_v57 = vadd.f32 %v693_v56, %v685_v55 }
0x12d6   :  { %1074 = vtanh.f32 %v695_v57 }
0x12e0   :  { %v1075_v58 = vpop.eup %1074 }
0x12e1   :  { %698 = vrot.lane.b32.xlu0 %v1075_v58, %s1213_s3 }
0x1353   :  { %v699_v59 = vpop.permute.xlu0 %698 }
0x1354   :  { %v701_v60 = vmul.f32 %v699_v59, %v684_v54 }
0x1356   :  { %v702_v61 = vpack.c.bf16 %v701_v60, %v701_v60 }
0x1358   :  { %704 = vrot.lane.b32.xlu1 %v702_v61, %s1203_s7 }
0x13ca   :  { %v705_v62 = vpop.permute.xlu1 %704 }
0x13cb   :  { %1010 = vmatmul.mubr.msk.bf16.vlgmr.msra.gmra.mrb[16].mxu1 %vm208_vm4, %v705_v62 }
0x149e   :  { %v743_v1 = vpop.f32.mrb[16].mxu1 }
0x149f   :  { %v749_v3 = vadd.f32 %v743_v1, %v185_v63  ;;  %v1011_v4 = vpop.f32.mrb[17].mxu1 }
0x14a0   :  { %v746_v5 = vpop.f32.mrb[18].mxu1 }
0x14a1   :  { %v750_v11 = vmul.f32 0.5, %v749_v3  ;;  %v1012_v12 = vpop.f32.mrb[19].mxu1 }
0x14a3   :  { %v751_v15 = vsel %vm194_vm3, %v750_v11, %v749_v3 }
0x14a4   :  { %1076 = vtanh.f32 %v751_v15 }
0x14ae   :  { %v1077_v7 = vpop.eup %1076 }
0x14af   :  { %v753_v16 = vadd.f32 1.0, %v1077_v7 }
0x14b1   :  { %v754_v19 = vmul.f32 0.5, %v753_v16 }
0x14b3   :  { %v755_v20 = vsel %vm194_vm3, %v754_v19, %v1077_v7 }
0x14b4   :  { %758 = vrot.lane.b32.xlu0 %v755_v20, %s1213_s3  ;;  %v756_v8 = vmul.f32 %v755_v20, %v695_v57 }
0x1526   :  { %v759_v21 = vpop.permute.xlu0 %758 }
0x1527   :  { %v761_v13 = vmul.f32 %v759_v21, %v755_v20 }
0x1529   :  { %763 = vrot.lane.b32.xlu1 %v761_v13, %s1213_s3 }
0x159b   :  { %v764_v22 = vpop.permute.xlu1 %763 }
0x159c   :  { %v766_v23 = vadd.f32 %v764_v22, %v756_v8 }
0x159e   :  { %1078 = vtanh.f32 %v766_v23 }
0x15a8   :  { %v1079_v30 = vpop.eup %1078 }
0x15a9   :  { %769 = vrot.lane.b32.xlu0 %v1079_v30, %s1213_s3 }
0x161b   :  { %v770_v31 = vpop.permute.xlu0 %769 }
0x161c   :  { %v772_v32 = vmul.f32 %v770_v31, %v755_v20 }
0x161e   :  { %785 = vrot.lane.b32.xlu1 %v772_v32, %s1203_s7  ;;  %s1215_s7 = smov [#allocation10]  }
0x161f   :  { %s877_s25 = sshll.u32 %s1215_s7, 4  ;;  %s878_s25 = int_to_ptr.vmem [resolvable:$true] %s877_s25 }
0x1620   :  { %s1172_s5 = scalar_lea.vmem %s878_s25, 128  ;;  %p1177_p5 = scmp.lt.s32.totalorder %s878_s25, %s878_s25 }
0x1621   :  { %p1173_p4 = scmp.ne.s32.totalorder %s878_s25, %s1172_s5  ;;  %p1178_p6 = scmp.lt.s32.totalorder %s1172_s5, %s1172_s5 }
0x1623   :  { %p1179_p7 = por %p1178_p6, %p1177_p5 }
0x1625   :  { %p1180_p8 = pnand %p1179_p7, %p1173_p4 }
0x1690   :  { %v786_v2 = vpop.permute.xlu1 %785 }
0x1691   :  { %1022 = vmatmul.mubr.msk.f32.vlgmr.msra.gmra.mrb[20].mxu0 %vm208_vm4, %v786_v2 }
0x1764   :  { %v855_v34 = vpop.f32.mrb[20].mxu0 }
0x1765   :  { %v856_v35 = vadd.f32 %v903_v33, %v855_v34  ;;  %v1023_v10 = vpop.f32.mrb[21].mxu0 }
0x1767   :  { %v859_v9 = vsel %vm195_vm5, %v856_v35, -1e+30 }
0x1768   :  { %860 = vmax.xlane.f32.xlu0 %v859_v9 }
0x17f5   :  { %v861_v36 = vpop.xlane.xlu0 %860 }
0x17f6   :  { %v862_v37 = vsub.f32 %v859_v9, %v861_v36 }
0x17f8   :  { %v863_v38 = vmul.f32 1.442695, %v862_v37 }
0x17fa   :  { %1080 = vpow2.f32 %v863_v38 }
0x1804   :  { %v1081_v39 = vpop.eup %1080 }
0x1805   :  { %v865_v40 = vsel %vm195_vm5, %v1081_v39, 0.0 }
0x1806   :  { %866 = vadd.xlane.f32.xlu1 %v865_v40 }
0x1893   :  { %v867_v41 = vpop.xlane.xlu1 %866 }
0x1894   :  { %1082 = vrcp.f32 %v867_v41 }
0x189e   :  { %v1083_v42 = vpop.eup %1082 }
0x189f   :  { %v869_v43 = vmul.f32 %v1083_v42, %v865_v40 }
0x18a1   :  { %870 = vst [vmem:[#allocation10] sm:$0xff] %v869_v43 }
0x18a2   :  { %1183 = shalt.err (!%p1180_p8)
}
0x18a3   :  { %s1184_s28 = scalar_lea.hbm %s1504_s6, 128 }
0x18a4   :  { %p1185_p9 = scmp.ne.s32.totalorder %s1504_s6, %s1184_s28  ;;  %p1188_p10 = scmp.lt.u32.totalorder %s1184_s28, %s1504_s6 }
0x18a6   :  { %p1190_p11 = pnand %p1188_p10, %p1185_p9 }
0x18a8   :  { %1193 = shalt.err (!%p1190_p11)
}
0x18a9   :  { %880 = dma.vmem_to_hbm [thread:$0]  %s878_s25, 128, %s1504_s6, [#allocation4]  }
0x18aa   :  { %1200 = dma.done.wait [#allocation4], 128  }
0x18ab   :  { %1201 = vsyncadd [#allocation4], 4294967168 }
0x18ac   :  { %884 = vsyncpa [#allocation3], 1 }
0x18ad   :  { %885 = vsyncpa [#allocation6], 1 }
0x18ae   :  { %886 = vsyncpa [#allocation9], 1 }
0x18af   :  { %887 = vsyncpa [#allocation4], 1 }

</bundles_post_ra>
